<compile_context>
chip_gen: v6e
topology: v6e:2x2x1
jax: 0.10.0
libtpu: 0.0.40
codegen_flags: <defaults>
</compile_context>

<pallas_src>
import jax
import jax.numpy as jnp
from jax import lax
from jax.experimental import pallas as pl
from jax.experimental.pallas import tpu as pltpu


def _lstm_textsubnet_kernel(x_ref, wih_ref, whh_ref, b_ref, wl_ref, bl_ref, y_ref):
    # x_ref   : (T*B_pad, D)   bf16  time-major, batch padded to sublane multiple
    # wih_ref : (D, 4H)        bf16  input->gates weight (transposed)
    # whh_ref : (H, 4H)        bf16  hidden->gates weight (transposed)
    # b_ref   : (1, 4H)        f32   bias_ih + bias_hh (folded once)
    # wl_ref  : (H, O_pad)     bf16  linear weight (transposed, zero-padded lanes)
    # bl_ref  : (1, O_pad)     f32   linear bias (zero-padded lanes)
    # y_ref   : (B_pad, O_pad) f32   lane-dense output slab
    TB, D = x_ref.shape
    H = whh_ref.shape[0]
    G = 4 * H
    B_pad = y_ref.shape[0]
    T = TB // B_pad

    whh = whh_ref[...]

    # Hoisted input projection + fused bias: ONE big matmul instead of T tiny
    # ones on the serial critical path. Result stays f32.
    xw = (
        jnp.dot(x_ref[...], wih_ref[...], preferred_element_type=jnp.float32)
        + b_ref[...]
    ).reshape(T, B_pad, G)

    # Lane mask selecting the 'g' (cell candidate) block; hoisted out of the loop.
    lane = lax.broadcasted_iota(jnp.int32, (B_pad, G), 1)
    g_mask = (lane >= 2 * H) & (lane < 3 * H)

    h = jnp.zeros((B_pad, H), jnp.float32)
    c = jnp.zeros((B_pad, H), jnp.float32)

    # Fully unrolled recurrence (T static & small). PyTorch gate order: i, f, g, o.
    for t in range(T):
        gates = xw[t] + jnp.dot(
            h.astype(jnp.bfloat16), whh, preferred_element_type=jnp.float32
        )  # (B_pad, 4H) f32
        # Two whole-vreg EUP passes + one select instead of 4 quarter-lane ops.
        act = jnp.where(g_mask, jnp.tanh(gates), jax.nn.sigmoid(gates))
        i_g = act[:, 0 * H:1 * H]
        f_g = act[:, 1 * H:2 * H]
        g_g = act[:, 2 * H:3 * H]
        o_g = act[:, 3 * H:4 * H]
        c = f_g * c + i_g * g_g
        h = o_g * jnp.tanh(c)

    # Dropout: nn.Dropout in eval mode is identity (deterministic forward).
    # TODO(synk): training-mode stochastic dropout not implemented (identity here).

    # Final linear into a lane-dense slab -> unmasked stores.
    y_ref[...] = (
        jnp.dot(h.astype(jnp.bfloat16), wl_ref[...],
                preferred_element_type=jnp.float32)
        + bl_ref[...]
    ).astype(y_ref.dtype)


def text_subnet_forward(x, params):
    """x: (B, T, D) float32, batch_first like the PyTorch module. Returns (B, O)."""
    B, T, D = x.shape
    w_ih = params["w_ih"]          # (4H, D)
    w_hh = params["w_hh"]          # (4H, H)
    b_ih = params["b_ih"]          # (4H,)
    b_hh = params["b_hh"]          # (4H,)
    w_l = params["w_lin"]          # (O, H)
    b_l = params["b_lin"]          # (O,)
    H = w_hh.shape[1]
    O = w_l.shape[0]

    B_pad = ((B + 7) // 8) * 8            # sublane-pad the batch
    O_pad = ((O + 127) // 128) * 128      # lane-dense output slab

    # Time-major, batch-padded, flattened to (T*B_pad, D) for the hoisted matmul.
    x_p = jnp.pad(x, ((0, B_pad - B), (0, 0), (0, 0)))
    x_tm = jnp.transpose(x_p, (1, 0, 2)).reshape(T * B_pad, D).astype(jnp.bfloat16)

    wih_t = jnp.transpose(w_ih).astype(jnp.bfloat16)              # (D, 4H)
    whh_t = jnp.transpose(w_hh).astype(jnp.bfloat16)              # (H, 4H)
    bias = (b_ih + b_hh).reshape(1, 4 * H).astype(jnp.float32)    # (1, 4H)
    wl_p = jnp.pad(jnp.transpose(w_l), ((0, 0), (0, O_pad - O))).astype(jnp.bfloat16)
    bl_p = jnp.pad(b_l.reshape(1, O), ((0, 0), (0, O_pad - O))).astype(jnp.float32)

    cost = pl.CostEstimate(
        flops=int(
            2 * T * B_pad * D * 4 * H       # hoisted input projection
            + 2 * T * B_pad * H * 4 * H     # recurrent h @ Whh
            + 2 * B_pad * H * O_pad         # final linear
        ),
        transcendentals=int(T * B_pad * (2 * 4 * H + H)),
        bytes_accessed=int(
            x_tm.size * 2 + wih_t.size * 2 + whh_t.size * 2
            + bias.size * 4 + wl_p.size * 2 + bl_p.size * 4
            + B_pad * O_pad * 4
        ),
    )

    vmem = pl.BlockSpec(memory_space=pltpu.MemorySpace.VMEM)
    y_pad = pl.pallas_call(
        _lstm_textsubnet_kernel,
        out_shape=jax.ShapeDtypeStruct((B_pad, O_pad), jnp.float32),
        in_specs=[vmem] * 6,
        out_specs=vmem,
        cost_estimate=cost,
    )(x_tm, wih_t, whh_t, bias, wl_p, bl_p)

    return y_pad[:B, :O]


def init_params(key, in_size, hidden_size, out_size):
    """Deterministic init, matching PyTorch's default uniform(-1/sqrt(H), 1/sqrt(H))."""
    ks = jax.random.split(key, 6)
    k_lstm = 1.0 / jnp.sqrt(hidden_size)
    k_lin = 1.0 / jnp.sqrt(hidden_size)
    u = lambda k, shape, bound: jax.random.uniform(
        k, shape, jnp.float32, -bound, bound
    )
    return {
        "w_ih": u(ks[0], (4 * hidden_size, in_size), k_lstm),
        "w_hh": u(ks[1], (4 * hidden_size, hidden_size), k_lstm),
        "b_ih": u(ks[2], (4 * hidden_size,), k_lstm),
        "b_hh": u(ks[3], (4 * hidden_size,), k_lstm),
        "w_lin": u(ks[4], (out_size, hidden_size), k_lin),
        "b_lin": u(ks[5], (out_size,), k_lin),
    }


if __name__ == "__main__":
    B, T, IN, HID, OUT = 2, 8, 16, 32, 8
    key = jax.random.PRNGKey(0)
    k_x, k_p = jax.random.split(key)
    x = jax.random.normal(k_x, (B, T, IN), jnp.float32)
    params = init_params(k_p, IN, HID, OUT)

    y = text_subnet_forward(x, params)
    y = jax.block_until_ready(y)
    assert y.shape == (B, OUT), y.shape
    print("KERNEL_OK")
</pallas_src>

<mosaic_0001>
module attributes {stable_mosaic.version = 11 : i64} {
  func.func @_lstm_textsubnet_kernel(%arg0: memref<64x16xbf16, #tpu.memory_space<vmem>>, %arg1: memref<16x128xbf16, #tpu.memory_space<vmem>>, %arg2: memref<32x128xbf16, #tpu.memory_space<vmem>>, %arg3: memref<1x128xf32, #tpu.memory_space<vmem>>, %arg4: memref<32x128xbf16, #tpu.memory_space<vmem>>, %arg5: memref<1x128xf32, #tpu.memory_space<vmem>>, %arg6: memref<8x128xf32, #tpu.memory_space<vmem>>) attributes {dimension_semantics = [], scalar_prefetch = 0 : i64, scratch_operands = 0 : i64, tpu.core_type = #tpu.core_type<tc>} {
    %c0 = arith.constant 0 : index
    %c0_0 = arith.constant 0 : index
    %0 = vector.load %arg2[%c0, %c0_0] : memref<32x128xbf16, #tpu.memory_space<vmem>>, vector<32x128xbf16>
    %c0_1 = arith.constant 0 : index
    %c0_2 = arith.constant 0 : index
    %1 = vector.load %arg0[%c0_1, %c0_2] : memref<64x16xbf16, #tpu.memory_space<vmem>>, vector<64x16xbf16>
    %c0_3 = arith.constant 0 : index
    %c0_4 = arith.constant 0 : index
    %2 = vector.load %arg1[%c0_3, %c0_4] : memref<16x128xbf16, #tpu.memory_space<vmem>>, vector<16x128xbf16>
    %cst = arith.constant dense<0.000000e+00> : vector<64x128xf32>
    %3 = tpu.matmul %1, %2, %cst {dimension_numbers = #tpu.dot_dimension_numbers<[1], [0], [0], [1], [0, 0, 1, 1], [], []>} : vector<64x16xbf16>, vector<16x128xbf16>, vector<64x128xf32> -> vector<64x128xf32>
    %c0_5 = arith.constant 0 : index
    %c0_6 = arith.constant 0 : index
    %4 = vector.load %arg3[%c0_5, %c0_6] : memref<1x128xf32, #tpu.memory_space<vmem>>, vector<1x128xf32>
    %5 = vector.broadcast %4 : vector<1x128xf32> to vector<64x128xf32>
    %6 = arith.addf %3, %5 : vector<64x128xf32>
    %7 = vector.shape_cast %6 : vector<64x128xf32> to vector<8x8x128xf32>
    %8 = tpu.iota {dimensions = array<i32: 1>} : vector<8x128xi32>
    %c64_i32 = arith.constant 64 : i32
    %9 = vector.broadcast %c64_i32 : i32 to vector<8x128xi32>
    %10 = arith.cmpi sge, %8, %9 : vector<8x128xi32>
    %c96_i32 = arith.constant 96 : i32
    %11 = vector.broadcast %c96_i32 : i32 to vector<8x128xi32>
    %12 = arith.cmpi slt, %8, %11 : vector<8x128xi32>
    %13 = arith.andi %10, %12 : vector<8x128xi1>
    %cst_7 = arith.constant 0.000000e+00 : f32
    %14 = vector.broadcast %cst_7 : f32 to vector<8x32xf32>
    %cst_8 = arith.constant 0.000000e+00 : f32
    %15 = vector.broadcast %cst_8 : f32 to vector<8x32xf32>
    %16 = vector.extract_strided_slice %7 {offsets = [0, 0, 0], sizes = [1, 8, 128], strides = [1, 1, 1]} : vector<8x8x128xf32> to vector<1x8x128xf32>
    %17 = vector.shape_cast %16 : vector<1x8x128xf32> to vector<8x128xf32>
    %18 = arith.truncf %14 : vector<8x32xf32> to vector<8x32xbf16>
    %cst_9 = arith.constant dense<0.000000e+00> : vector<8x128xf32>
    %19 = tpu.matmul %18, %0, %cst_9 {dimension_numbers = #tpu.dot_dimension_numbers<[1], [0], [0], [1], [0, 0, 1, 1], [], []>} : vector<8x32xbf16>, vector<32x128xbf16>, vector<8x128xf32> -> vector<8x128xf32>
    %20 = arith.addf %17, %19 : vector<8x128xf32>
    %21 = math.tanh %20 : vector<8x128xf32>
    %22 = arith.negf %20 : vector<8x128xf32>
    %23 = math.exp %22 : vector<8x128xf32>
    %cst_10 = arith.constant 1.000000e+00 : f32
    %24 = vector.broadcast %cst_10 : f32 to vector<8x128xf32>
    %25 = arith.addf %24, %23 : vector<8x128xf32>
    %26 = arith.divf %24, %25 : vector<8x128xf32>
    %27 = arith.select %13, %21, %26 : vector<8x128xi1>, vector<8x128xf32>
    %28 = vector.extract_strided_slice %27 {offsets = [0, 0], sizes = [8, 32], strides = [1, 1]} : vector<8x128xf32> to vector<8x32xf32>
    %29 = vector.extract_strided_slice %27 {offsets = [0, 32], sizes = [8, 32], strides = [1, 1]} : vector<8x128xf32> to vector<8x32xf32>
    %30 = vector.extract_strided_slice %27 {offsets = [0, 64], sizes = [8, 32], strides = [1, 1]} : vector<8x128xf32> to vector<8x32xf32>
    %31 = vector.extract_strided_slice %27 {offsets = [0, 96], sizes = [8, 32], strides = [1, 1]} : vector<8x128xf32> to vector<8x32xf32>
    %32 = arith.mulf %29, %15 : vector<8x32xf32>
    %33 = arith.mulf %28, %30 : vector<8x32xf32>
    %34 = arith.addf %32, %33 : vector<8x32xf32>
    %35 = math.tanh %34 : vector<8x32xf32>
    %36 = arith.mulf %31, %35 : vector<8x32xf32>
    %37 = vector.extract_strided_slice %7 {offsets = [1, 0, 0], sizes = [1, 8, 128], strides = [1, 1, 1]} : vector<8x8x128xf32> to vector<1x8x128xf32>
    %38 = vector.shape_cast %37 : vector<1x8x128xf32> to vector<8x128xf32>
    %39 = arith.truncf %36 : vector<8x32xf32> to vector<8x32xbf16>
    %cst_11 = arith.constant dense<0.000000e+00> : vector<8x128xf32>
    %40 = tpu.matmul %39, %0, %cst_11 {dimension_numbers = #tpu.dot_dimension_numbers<[1], [0], [0], [1], [0, 0, 1, 1], [], []>} : vector<8x32xbf16>, vector<32x128xbf16>, vector<8x128xf32> -> vector<8x128xf32>
    %41 = arith.addf %38, %40 : vector<8x128xf32>
    %42 = math.tanh %41 : vector<8x128xf32>
    %43 = arith.negf %41 : vector<8x128xf32>
    %44 = math.exp %43 : vector<8x128xf32>
    %cst_12 = arith.constant 1.000000e+00 : f32
    %45 = vector.broadcast %cst_12 : f32 to vector<8x128xf32>
    %46 = arith.addf %45, %44 : vector<8x128xf32>
    %47 = arith.divf %45, %46 : vector<8x128xf32>
    %48 = arith.select %13, %42, %47 : vector<8x128xi1>, vector<8x128xf32>
    %49 = vector.extract_strided_slice %48 {offsets = [0, 0], sizes = [8, 32], strides = [1, 1]} : vector<8x128xf32> to vector<8x32xf32>
    %50 = vector.extract_strided_slice %48 {offsets = [0, 32], sizes = [8, 32], strides = [1, 1]} : vector<8x128xf32> to vector<8x32xf32>
    %51 = vector.extract_strided_slice %48 {offsets = [0, 64], sizes = [8, 32], strides = [1, 1]} : vector<8x128xf32> to vector<8x32xf32>
    %52 = vector.extract_strided_slice %48 {offsets = [0, 96], sizes = [8, 32], strides = [1, 1]} : vector<8x128xf32> to vector<8x32xf32>
    %53 = arith.mulf %50, %34 : vector<8x32xf32>
    %54 = arith.mulf %49, %51 : vector<8x32xf32>
    %55 = arith.addf %53, %54 : vector<8x32xf32>
    %56 = math.tanh %55 : vector<8x32xf32>
    %57 = arith.mulf %52, %56 : vector<8x32xf32>
    %58 = vector.extract_strided_slice %7 {offsets = [2, 0, 0], sizes = [1, 8, 128], strides = [1, 1, 1]} : vector<8x8x128xf32> to vector<1x8x128xf32>
    %59 = vector.shape_cast %58 : vector<1x8x128xf32> to vector<8x128xf32>
    %60 = arith.truncf %57 : vector<8x32xf32> to vector<8x32xbf16>
    %cst_13 = arith.constant dense<0.000000e+00> : vector<8x128xf32>
    %61 = tpu.matmul %60, %0, %cst_13 {dimension_numbers = #tpu.dot_dimension_numbers<[1], [0], [0], [1], [0, 0, 1, 1], [], []>} : vector<8x32xbf16>, vector<32x128xbf16>, vector<8x128xf32> -> vector<8x128xf32>
    %62 = arith.addf %59, %61 : vector<8x128xf32>
    %63 = math.tanh %62 : vector<8x128xf32>
    %64 = arith.negf %62 : vector<8x128xf32>
    %65 = math.exp %64 : vector<8x128xf32>
    %cst_14 = arith.constant 1.000000e+00 : f32
    %66 = vector.broadcast %cst_14 : f32 to vector<8x128xf32>
    %67 = arith.addf %66, %65 : vector<8x128xf32>
    %68 = arith.divf %66, %67 : vector<8x128xf32>
    %69 = arith.select %13, %63, %68 : vector<8x128xi1>, vector<8x128xf32>
    %70 = vector.extract_strided_slice %69 {offsets = [0, 0], sizes = [8, 32], strides = [1, 1]} : vector<8x128xf32> to vector<8x32xf32>
    %71 = vector.extract_strided_slice %69 {offsets = [0, 32], sizes = [8, 32], strides = [1, 1]} : vector<8x128xf32> to vector<8x32xf32>
    %72 = vector.extract_strided_slice %69 {offsets = [0, 64], sizes = [8, 32], strides = [1, 1]} : vector<8x128xf32> to vector<8x32xf32>
    %73 = vector.extract_strided_slice %69 {offsets = [0, 96], sizes = [8, 32], strides = [1, 1]} : vector<8x128xf32> to vector<8x32xf32>
    %74 = arith.mulf %71, %55 : vector<8x32xf32>
    %75 = arith.mulf %70, %72 : vector<8x32xf32>
    %76 = arith.addf %74, %75 : vector<8x32xf32>
    %77 = math.tanh %76 : vector<8x32xf32>
    %78 = arith.mulf %73, %77 : vector<8x32xf32>
    %79 = vector.extract_strided_slice %7 {offsets = [3, 0, 0], sizes = [1, 8, 128], strides = [1, 1, 1]} : vector<8x8x128xf32> to vector<1x8x128xf32>
    %80 = vector.shape_cast %79 : vector<1x8x128xf32> to vector<8x128xf32>
    %81 = arith.truncf %78 : vector<8x32xf32> to vector<8x32xbf16>
    %cst_15 = arith.constant dense<0.000000e+00> : vector<8x128xf32>
    %82 = tpu.matmul %81, %0, %cst_15 {dimension_numbers = #tpu.dot_dimension_numbers<[1], [0], [0], [1], [0, 0, 1, 1], [], []>} : vector<8x32xbf16>, vector<32x128xbf16>, vector<8x128xf32> -> vector<8x128xf32>
    %83 = arith.addf %80, %82 : vector<8x128xf32>
    %84 = math.tanh %83 : vector<8x128xf32>
    %85 = arith.negf %83 : vector<8x128xf32>
    %86 = math.exp %85 : vector<8x128xf32>
    %cst_16 = arith.constant 1.000000e+00 : f32
    %87 = vector.broadcast %cst_16 : f32 to vector<8x128xf32>
    %88 = arith.addf %87, %86 : vector<8x128xf32>
    %89 = arith.divf %87, %88 : vector<8x128xf32>
    %90 = arith.select %13, %84, %89 : vector<8x128xi1>, vector<8x128xf32>
    %91 = vector.extract_strided_slice %90 {offsets = [0, 0], sizes = [8, 32], strides = [1, 1]} : vector<8x128xf32> to vector<8x32xf32>
    %92 = vector.extract_strided_slice %90 {offsets = [0, 32], sizes = [8, 32], strides = [1, 1]} : vector<8x128xf32> to vector<8x32xf32>
    %93 = vector.extract_strided_slice %90 {offsets = [0, 64], sizes = [8, 32], strides = [1, 1]} : vector<8x128xf32> to vector<8x32xf32>
    %94 = vector.extract_strided_slice %90 {offsets = [0, 96], sizes = [8, 32], strides = [1, 1]} : vector<8x128xf32> to vector<8x32xf32>
    %95 = arith.mulf %92, %76 : vector<8x32xf32>
    %96 = arith.mulf %91, %93 : vector<8x32xf32>
    %97 = arith.addf %95, %96 : vector<8x32xf32>
    %98 = math.tanh %97 : vector<8x32xf32>
    %99 = arith.mulf %94, %98 : vector<8x32xf32>
    %100 = vector.extract_strided_slice %7 {offsets = [4, 0, 0], sizes = [1, 8, 128], strides = [1, 1, 1]} : vector<8x8x128xf32> to vector<1x8x128xf32>
    %101 = vector.shape_cast %100 : vector<1x8x128xf32> to vector<8x128xf32>
    %102 = arith.truncf %99 : vector<8x32xf32> to vector<8x32xbf16>
    %cst_17 = arith.constant dense<0.000000e+00> : vector<8x128xf32>
    %103 = tpu.matmul %102, %0, %cst_17 {dimension_numbers = #tpu.dot_dimension_numbers<[1], [0], [0], [1], [0, 0, 1, 1], [], []>} : vector<8x32xbf16>, vector<32x128xbf16>, vector<8x128xf32> -> vector<8x128xf32>
    %104 = arith.addf %101, %103 : vector<8x128xf32>
    %105 = math.tanh %104 : vector<8x128xf32>
    %106 = arith.negf %104 : vector<8x128xf32>
    %107 = math.exp %106 : vector<8x128xf32>
    %cst_18 = arith.constant 1.000000e+00 : f32
    %108 = vector.broadcast %cst_18 : f32 to vector<8x128xf32>
    %109 = arith.addf %108, %107 : vector<8x128xf32>
    %110 = arith.divf %108, %109 : vector<8x128xf32>
    %111 = arith.select %13, %105, %110 : vector<8x128xi1>, vector<8x128xf32>
    %112 = vector.extract_strided_slice %111 {offsets = [0, 0], sizes = [8, 32], strides = [1, 1]} : vector<8x128xf32> to vector<8x32xf32>
    %113 = vector.extract_strided_slice %111 {offsets = [0, 32], sizes = [8, 32], strides = [1, 1]} : vector<8x128xf32> to vector<8x32xf32>
    %114 = vector.extract_strided_slice %111 {offsets = [0, 64], sizes = [8, 32], strides = [1, 1]} : vector<8x128xf32> to vector<8x32xf32>
    %115 = vector.extract_strided_slice %111 {offsets = [0, 96], sizes = [8, 32], strides = [1, 1]} : vector<8x128xf32> to vector<8x32xf32>
    %116 = arith.mulf %113, %97 : vector<8x32xf32>
    %117 = arith.mulf %112, %114 : vector<8x32xf32>
    %118 = arith.addf %116, %117 : vector<8x32xf32>
    %119 = math.tanh %118 : vector<8x32xf32>
    %120 = arith.mulf %115, %119 : vector<8x32xf32>
    %121 = vector.extract_strided_slice %7 {offsets = [5, 0, 0], sizes = [1, 8, 128], strides = [1, 1, 1]} : vector<8x8x128xf32> to vector<1x8x128xf32>
    %122 = vector.shape_cast %121 : vector<1x8x128xf32> to vector<8x128xf32>
    %123 = arith.truncf %120 : vector<8x32xf32> to vector<8x32xbf16>
    %cst_19 = arith.constant dense<0.000000e+00> : vector<8x128xf32>
    %124 = tpu.matmul %123, %0, %cst_19 {dimension_numbers = #tpu.dot_dimension_numbers<[1], [0], [0], [1], [0, 0, 1, 1], [], []>} : vector<8x32xbf16>, vector<32x128xbf16>, vector<8x128xf32> -> vector<8x128xf32>
    %125 = arith.addf %122, %124 : vector<8x128xf32>
    %126 = math.tanh %125 : vector<8x128xf32>
    %127 = arith.negf %125 : vector<8x128xf32>
    %128 = math.exp %127 : vector<8x128xf32>
    %cst_20 = arith.constant 1.000000e+00 : f32
    %129 = vector.broadcast %cst_20 : f32 to vector<8x128xf32>
    %130 = arith.addf %129, %128 : vector<8x128xf32>
    %131 = arith.divf %129, %130 : vector<8x128xf32>
    %132 = arith.select %13, %126, %131 : vector<8x128xi1>, vector<8x128xf32>
    %133 = vector.extract_strided_slice %132 {offsets = [0, 0], sizes = [8, 32], strides = [1, 1]} : vector<8x128xf32> to vector<8x32xf32>
    %134 = vector.extract_strided_slice %132 {offsets = [0, 32], sizes = [8, 32], strides = [1, 1]} : vector<8x128xf32> to vector<8x32xf32>
    %135 = vector.extract_strided_slice %132 {offsets = [0, 64], sizes = [8, 32], strides = [1, 1]} : vector<8x128xf32> to vector<8x32xf32>
    %136 = vector.extract_strided_slice %132 {offsets = [0, 96], sizes = [8, 32], strides = [1, 1]} : vector<8x128xf32> to vector<8x32xf32>
    %137 = arith.mulf %134, %118 : vector<8x32xf32>
    %138 = arith.mulf %133, %135 : vector<8x32xf32>
    %139 = arith.addf %137, %138 : vector<8x32xf32>
    %140 = math.tanh %139 : vector<8x32xf32>
    %141 = arith.mulf %136, %140 : vector<8x32xf32>
    %142 = vector.extract_strided_slice %7 {offsets = [6, 0, 0], sizes = [1, 8, 128], strides = [1, 1, 1]} : vector<8x8x128xf32> to vector<1x8x128xf32>
    %143 = vector.shape_cast %142 : vector<1x8x128xf32> to vector<8x128xf32>
    %144 = arith.truncf %141 : vector<8x32xf32> to vector<8x32xbf16>
    %cst_21 = arith.constant dense<0.000000e+00> : vector<8x128xf32>
    %145 = tpu.matmul %144, %0, %cst_21 {dimension_numbers = #tpu.dot_dimension_numbers<[1], [0], [0], [1], [0, 0, 1, 1], [], []>} : vector<8x32xbf16>, vector<32x128xbf16>, vector<8x128xf32> -> vector<8x128xf32>
    %146 = arith.addf %143, %145 : vector<8x128xf32>
    %147 = math.tanh %146 : vector<8x128xf32>
    %148 = arith.negf %146 : vector<8x128xf32>
    %149 = math.exp %148 : vector<8x128xf32>
    %cst_22 = arith.constant 1.000000e+00 : f32
    %150 = vector.broadcast %cst_22 : f32 to vector<8x128xf32>
    %151 = arith.addf %150, %149 : vector<8x128xf32>
    %152 = arith.divf %150, %151 : vector<8x128xf32>
    %153 = arith.select %13, %147, %152 : vector<8x128xi1>, vector<8x128xf32>
    %154 = vector.extract_strided_slice %153 {offsets = [0, 0], sizes = [8, 32], strides = [1, 1]} : vector<8x128xf32> to vector<8x32xf32>
    %155 = vector.extract_strided_slice %153 {offsets = [0, 32], sizes = [8, 32], strides = [1, 1]} : vector<8x128xf32> to vector<8x32xf32>
    %156 = vector.extract_strided_slice %153 {offsets = [0, 64], sizes = [8, 32], strides = [1, 1]} : vector<8x128xf32> to vector<8x32xf32>
    %157 = vector.extract_strided_slice %153 {offsets = [0, 96], sizes = [8, 32], strides = [1, 1]} : vector<8x128xf32> to vector<8x32xf32>
    %158 = arith.mulf %155, %139 : vector<8x32xf32>
    %159 = arith.mulf %154, %156 : vector<8x32xf32>
    %160 = arith.addf %158, %159 : vector<8x32xf32>
    %161 = math.tanh %160 : vector<8x32xf32>
    %162 = arith.mulf %157, %161 : vector<8x32xf32>
    %163 = vector.extract_strided_slice %7 {offsets = [7, 0, 0], sizes = [1, 8, 128], strides = [1, 1, 1]} : vector<8x8x128xf32> to vector<1x8x128xf32>
    %164 = vector.shape_cast %163 : vector<1x8x128xf32> to vector<8x128xf32>
    %165 = arith.truncf %162 : vector<8x32xf32> to vector<8x32xbf16>
    %cst_23 = arith.constant dense<0.000000e+00> : vector<8x128xf32>
    %166 = tpu.matmul %165, %0, %cst_23 {dimension_numbers = #tpu.dot_dimension_numbers<[1], [0], [0], [1], [0, 0, 1, 1], [], []>} : vector<8x32xbf16>, vector<32x128xbf16>, vector<8x128xf32> -> vector<8x128xf32>
    %167 = arith.addf %164, %166 : vector<8x128xf32>
    %168 = math.tanh %167 : vector<8x128xf32>
    %169 = arith.negf %167 : vector<8x128xf32>
    %170 = math.exp %169 : vector<8x128xf32>
    %cst_24 = arith.constant 1.000000e+00 : f32
    %171 = vector.broadcast %cst_24 : f32 to vector<8x128xf32>
    %172 = arith.addf %171, %170 : vector<8x128xf32>
    %173 = arith.divf %171, %172 : vector<8x128xf32>
    %174 = arith.select %13, %168, %173 : vector<8x128xi1>, vector<8x128xf32>
    %175 = vector.extract_strided_slice %174 {offsets = [0, 0], sizes = [8, 32], strides = [1, 1]} : vector<8x128xf32> to vector<8x32xf32>
    %176 = vector.extract_strided_slice %174 {offsets = [0, 32], sizes = [8, 32], strides = [1, 1]} : vector<8x128xf32> to vector<8x32xf32>
    %177 = vector.extract_strided_slice %174 {offsets = [0, 64], sizes = [8, 32], strides = [1, 1]} : vector<8x128xf32> to vector<8x32xf32>
    %178 = vector.extract_strided_slice %174 {offsets = [0, 96], sizes = [8, 32], strides = [1, 1]} : vector<8x128xf32> to vector<8x32xf32>
    %179 = arith.mulf %176, %160 : vector<8x32xf32>
    %180 = arith.mulf %175, %177 : vector<8x32xf32>
    %181 = arith.addf %179, %180 : vector<8x32xf32>
    %182 = math.tanh %181 : vector<8x32xf32>
    %183 = arith.mulf %178, %182 : vector<8x32xf32>
    %184 = arith.truncf %183 : vector<8x32xf32> to vector<8x32xbf16>
    %c0_25 = arith.constant 0 : index
    %c0_26 = arith.constant 0 : index
    %185 = vector.load %arg4[%c0_25, %c0_26] : memref<32x128xbf16, #tpu.memory_space<vmem>>, vector<32x128xbf16>
    %cst_27 = arith.constant dense<0.000000e+00> : vector<8x128xf32>
    %186 = tpu.matmul %184, %185, %cst_27 {dimension_numbers = #tpu.dot_dimension_numbers<[1], [0], [0], [1], [0, 0, 1, 1], [], []>} : vector<8x32xbf16>, vector<32x128xbf16>, vector<8x128xf32> -> vector<8x128xf32>
    %c0_28 = arith.constant 0 : index
    %c0_29 = arith.constant 0 : index
    %187 = vector.load %arg5[%c0_28, %c0_29] : memref<1x128xf32, #tpu.memory_space<vmem>>, vector<1x128xf32>
    %188 = vector.broadcast %187 : vector<1x128xf32> to vector<8x128xf32>
    %189 = arith.addf %186, %188 : vector<8x128xf32>
    %c0_30 = arith.constant 0 : index
    %c0_31 = arith.constant 0 : index
    %190 = vector.load %arg6[%c0_30, %c0_31] : memref<8x128xf32, #tpu.memory_space<vmem>>, vector<8x128xf32>
    tpu.vector_store %arg6[%c0_30, %c0_31], %189 {strides = array<i32>} : memref<8x128xf32, #tpu.memory_space<vmem>>, vector<8x128xf32>,
    return
  }
}

</mosaic_0001>

<bundles_post_ra>
// kernel: tpu_custom_call.1
= control target key start
LH: loop header
LB: loop body
LE: loop exit
PB: predicated region body
PF: predicated region fallthrough
CT: control target
= control target key end

     0   :  { %v1079_v1 = vmov 0.0   ;;  %vm72_vm0 = vcmask 130048   ;;  %vm1080_vm1 = vmmov 0   ;;  %s1304_s0 = inlined_call_operand.vmem [shape: bf16[64,16], index: 0, kind: input, shape index: {}]   ;;  %s1305_s1 = inlined_call_operand.vmem [shape: bf16[16,128], index: 1, kind: input, shape index: {}]   ;;  %s1306_s2 = inlined_call_operand.vmem [shape: bf16[32,128], index: 2, kind: input, shape index: {}]   ;;  %s1307_s3 = inlined_call_operand.vmem [shape: f32[1,128], index: 3, kind: input, shape index: {}]   ;;  %s1308_s4 = inlined_call_operand.vmem [shape: bf16[32,128], index: 4, kind: input, shape index: {}]   ;;  %s1309_s5 = inlined_call_operand.vmem [shape: f32[1,128], index: 5, kind: input, shape index: {}]   ;;  %s1310_s6 = inlined_call_operand.hbm [shape: f32[8,128], index: 6, kind: output, shape index: {}]  }
   0x1   :  { %v984_v0 = vld [vmem:[%s1305_s1] sm:$0xff]   ;;  %906 = vmatprep.subr.bf16.mxu1 %v1079_v1  ;;  %v1127_v2 = vld [vmem:[%s1306_s2 + $0x8] sm:$0xff]   ;;  %910 = vmatprep.mubr.msk.bf16.mxu1 %vm1080_vm1, %v1079_v1 }
   0x2   :  { %896 = vmatprep.subr.bf16.mxu0 %v984_v0  ;;  %v986_v3 = vld [vmem:[%s1304_s0] sm:$0xff]   ;;  %907 = vmatpush3.bf16.msra.mxu1 %v1127_v2  ;;  %v987_v4 = vld [vmem:[%s1304_s0 + $0x8] sm:$0xff]  }
   0x3   :  { %897 = vmatpush3.bf16.msra.mxu0 %v984_v0  ;;  %898 = vmatprep.mubr.msk.bf16.mxu0 %vm72_vm0, %v986_v3  ;;  %v1141_v5 = vld [vmem:[%s1306_s2] sm:$0xff]  }
   0x4   :  { %908 = vmatprep.subr.bf16.mxu1 %v1079_v1  ;;  %922 = vmatprep.subr.bf16.mxu0 %v1079_v1 }
   0x6   :  { %899 = vmatmul.mubr.msk.bf16.vlgmr.msra.gmra.mxu0 %vm72_vm0, %v987_v4  ;;  %909 = vmatpush3.bf16.msra.mxu1 %v1141_v5 }
   0x7   :  { %923 = vmatpush3.bf16.msra.mxu0 %v1127_v2 }
   0x8   :  { %11 = vsyncpa [#allocation3], 0  ;;  %914 = vmatprep.subr.bf16.mxu1 %v1079_v1  ;;  %924 = vmatprep.subr.bf16.mxu0 %v1079_v1  ;;  %v1081_v6 = vmov 0   ;;  %v1164_v8 = vld [vmem:[%s1307_s3] ss:$0 sm:$0xff]  ;;  %v150_v19 = vlaneseq  ;;  %s1082_s3 = smov 64  }
   0x9   :  { %911 = vmatmul.mubr.bf16.vlgmr.msra.gmra.mxu1 %v1081_v6  ;;  %s1083_s7 = smov 32   ;;  %vm167_vm5 = vcmask 261120   ;;  %v989_v54 = vld [vmem:[%s1304_s0 + $0x10] sm:$0xff]   ;;  %v990_v55 = vld [vmem:[%s1304_s0 + $0x18] sm:$0xff]   ;;  %v992_v21 = vld [vmem:[%s1308_s4] sm:$0xff]   ;;  %s1084_s17 = smov [#allocation2]  }
   0xa   :  { %915 = vmatpush3.bf16.msra.mxu1 %v1127_v2  ;;  %918 = vmatprep.mubr.msk.bf16.mxu1 %vm1080_vm1, %v1079_v1  ;;  %v151_v20 = vand.u32 127, %v150_v19 }
   0xb   :  { %916 = vmatprep.subr.bf16.mxu1 %v1079_v1  ;;  %925 = vmatpush3.bf16.msra.mxu0 %v1141_v5 }
   0xc   :  { %938 = vmatprep.subr.bf16.mxu0 %v1079_v1  ;;  %vm152_vm2 = vcmp.ge.s32.totalorder %v151_v20, 64  ;;  %vm153_vm3 = vcmp.lt.s32.totalorder %v151_v20, 96  ;;  %902 = vmatprep.mubr.msk.bf16.mxu0 %vm72_vm0, %v989_v54 }
   0xd   :  { %vm1167_vm4 = vmand %vm152_vm2, %vm153_vm3 }
   0xe   :  { %917 = vmatpush3.bf16.msra.mxu1 %v1141_v5  ;;  %903 = vmatmul.mubr.msk.bf16.gmra.mxu0 %vm72_vm0, %v990_v55 }
   0xf   :  { %930 = vmatprep.subr.bf16.mxu1 %v1079_v1  ;;  %926 = vmatprep.mubr.msk.bf16.mxu0 %vm1080_vm1, %v1079_v1 }
  0xc6   :  { %v1159_v7 = vpop.f32.mrf.mxu0 }
  0xc7   :  { %v128_v3 = vadd.f32 %v1159_v7, %v1164_v8 }
  0xc8   :  { %v119_v9 = vpop.f32.mrf.mxu0 }
  0xc9   :  { %v120_v10 = vadd.f32 %v1164_v8, %v119_v9  ;;  %v205_v11 = vpop.f32.mrf.mxu1 }
  0xca   :  { %v1184_v35 = vpop.f32.mrf.mxu0 }
  0xcb   :  { %v211_v12 = vadd.f32 %v205_v11, %v120_v10  ;;  %v912_v13 = vpop.f32.mrf.mxu1 }
  0xcc   :  { %v122_v36 = vpop.f32.mrf.mxu0 }
  0xcd   :  { %v845_v14 = vmul.f32 -1.442695, %v211_v12  ;;  %v208_v15 = vpop.f32.mrf.mxu1  ;;  %v123_v37 = vadd.f32 %v1164_v8, %v122_v36 }
  0xce   :  { %v1210_v61 = vpop.f32.mrf.mxu0 }
  0xcf   :  { %993 = vpow2.f32 %v845_v14  ;;  %v913_v16 = vpop.f32.mrf.mxu1 }
  0xd0   :  { %995 = vtanh.f32 %v211_v12  ;;  %v1212_v62 = vpop.f32.mrf.mxu0 }
  0xd2   :  { %v1214_v63 = vpop.f32.mrf.mxu0 }
  0xd4   :  { %v1216_v0 = vpop.f32.mrf.mxu0 }
  0xdc   :  { %v994_v17 = vpop.eup %993 }
  0xdd   :  { %v216_v18 = vadd.f32 1.0, %v994_v17  ;;  %v996_v22 = vpop.eup %995 }
  0xdf   :  { %997 = vrcp.f32 %v216_v18 }
  0xec   :  { %v998_v23 = vpop.eup %997 }
  0xed   :  { %v219_v24 = vsel %vm1167_vm4, %v996_v22, %v998_v23 }
  0xee   :  { %222 = vrot.lane.b32.xlu0 %v219_v24, %s1082_s3  ;;  %v220_v27 = vmul.f32 0.0, %v219_v24 }
 0x160   :  { %v223_v25 = vpop.permute.xlu0 %222 }
 0x161   :  { %v225_v26 = vmul.f32 %v223_v25, %v219_v24 }
 0x163   :  { %227 = vrot.lane.b32.xlu0 %v225_v26, %s1083_s7 }
 0x1d5   :  { %v228_v28 = vpop.permute.xlu0 %227 }
 0x1d6   :  { %v230_v29 = vadd.f32 %v228_v28, %v220_v27  ;;  %v131_v28 = vadd.f32 %v1184_v35, %v1164_v8 }
 0x1d8   :  { %999 = vtanh.f32 %v230_v29 }
 0x1e5   :  { %v1000_v30 = vpop.eup %999 }
 0x1e6   :  { %233 = vrot.lane.b32.xlu1 %v1000_v30, %s1082_s3 }
 0x258   :  { %v234_v31 = vpop.permute.xlu1 %233 }
 0x259   :  { %v236_v32 = vmul.f32 %v234_v31, %v219_v24 }
 0x25b   :  { %v237_v33 = vpack.c.bf16 %v236_v32, %v236_v32 }
 0x25d   :  { %239 = vrot.lane.b32.xlu1 %v237_v33, %s1083_s7 }
 0x2cf   :  { %v240_v34 = vpop.permute.xlu1 %239 }
 0x2d0   :  { %919 = vmatmul.mubr.msk.bf16.vlgmr.msra.gmra.mxu1 %vm167_vm5, %v240_v34 }
 0x2d1   :  { %931 = vmatpush3.bf16.msra.mxu1 %v1127_v2  ;;  %934 = vmatprep.mubr.msk.bf16.mxu1 %vm1080_vm1, %v1079_v1 }
 0x2d2   :  { %932 = vmatprep.subr.bf16.mxu1 %v1079_v1 }
 0x2d5   :  { %933 = vmatpush3.bf16.msra.mxu1 %v1141_v5 }
 0x2d6   :  { %946 = vmatprep.subr.bf16.mxu1 %v1079_v1 }
 0x390   :  { %v278_v38 = vpop.f32.mrf.mxu1 }
 0x391   :  { %v284_v39 = vadd.f32 %v278_v38, %v123_v37 }
 0x392   :  { %v920_v40 = vpop.f32.mrf.mxu1 }
 0x393   :  { %v847_v41 = vmul.f32 -1.442695, %v284_v39 }
 0x394   :  { %v281_v42 = vpop.f32.mrf.mxu1 }
 0x395   :  { %1001 = vpow2.f32 %v847_v41 }
 0x396   :  { %v921_v43 = vpop.f32.mrf.mxu1  ;;  %1003 = vtanh.f32 %v284_v39 }
 0x3a2   :  { %v1002_v44 = vpop.eup %1001 }
 0x3a3   :  { %v289_v45 = vadd.f32 1.0, %v1002_v44  ;;  %v1004_v46 = vpop.eup %1003 }
 0x3a5   :  { %1005 = vrcp.f32 %v289_v45 }
 0x3b2   :  { %v1006_v47 = vpop.eup %1005 }
 0x3b3   :  { %v292_v48 = vsel %vm1167_vm4, %v1004_v46, %v1006_v47 }
 0x3b4   :  { %295 = vrot.lane.b32.xlu0 %v292_v48, %s1082_s3  ;;  %v293_v51 = vmul.f32 %v292_v48, %v230_v29 }
 0x426   :  { %v296_v49 = vpop.permute.xlu0 %295 }
 0x427   :  { %v298_v50 = vmul.f32 %v296_v49, %v292_v48 }
 0x429   :  { %300 = vrot.lane.b32.xlu1 %v298_v50, %s1083_s7  ;;  %v136_v50 = vadd.f32 %v1164_v8, %v1212_v62 }
 0x49b   :  { %v301_v52 = vpop.permute.xlu1 %300 }
 0x49c   :  { %v303_v53 = vadd.f32 %v301_v52, %v293_v51 }
 0x49e   :  { %1007 = vtanh.f32 %v303_v53 }
 0x4ab   :  { %v1008_v56 = vpop.eup %1007 }
 0x4ac   :  { %306 = vrot.lane.b32.xlu0 %v1008_v56, %s1082_s3 }
 0x51e   :  { %v307_v57 = vpop.permute.xlu0 %306 }
 0x51f   :  { %v309_v58 = vmul.f32 %v307_v57, %v292_v48 }
 0x521   :  { %v310_v59 = vpack.c.bf16 %v309_v58, %v309_v58 }
 0x523   :  { %312 = vrot.lane.b32.xlu1 %v310_v59, %s1083_s7 }
 0x595   :  { %v313_v60 = vpop.permute.xlu1 %312 }
 0x596   :  { %927 = vmatmul.mubr.msk.bf16.vlgmr.msra.gmra.mxu0 %vm167_vm5, %v313_v60 }
 0x597   :  { %939 = vmatpush3.bf16.msra.mxu0 %v1127_v2  ;;  %942 = vmatprep.mubr.msk.bf16.mxu0 %vm1080_vm1, %v1079_v1 }
 0x598   :  { %940 = vmatprep.subr.bf16.mxu0 %v1079_v1 }
 0x59b   :  { %941 = vmatpush3.bf16.msra.mxu0 %v1141_v5 }
 0x59c   :  { %954 = vmatprep.subr.bf16.mxu0 %v1079_v1 }
 0x656   :  { %v351_v4 = vpop.f32.mrf.mxu0 }
 0x657   :  { %v357_v6 = vadd.f32 %v351_v4, %v128_v3 }
 0x658   :  { %v928_v9 = vpop.f32.mrf.mxu0 }
 0x659   :  { %v849_v10 = vmul.f32 -1.442695, %v357_v6 }
 0x65a   :  { %v354_v11 = vpop.f32.mrf.mxu0 }
 0x65b   :  { %1009 = vpow2.f32 %v849_v10 }
 0x65c   :  { %v929_v12 = vpop.f32.mrf.mxu0  ;;  %1011 = vtanh.f32 %v357_v6 }
 0x668   :  { %v1010_v13 = vpop.eup %1009 }
 0x669   :  { %v362_v14 = vadd.f32 1.0, %v1010_v13  ;;  %v1012_v15 = vpop.eup %1011 }
 0x66b   :  { %1013 = vrcp.f32 %v362_v14 }
 0x678   :  { %v1014_v16 = vpop.eup %1013 }
 0x679   :  { %v365_v17 = vsel %vm1167_vm4, %v1012_v15, %v1014_v16  ;;  %v139_v16 = vadd.f32 %v1164_v8, %v1216_v0 }
 0x67a   :  { %368 = vrot.lane.b32.xlu0 %v365_v17, %s1082_s3  ;;  %v366_v19 = vmul.f32 %v365_v17, %v303_v53 }
 0x6ec   :  { %v369_v18 = vpop.permute.xlu0 %368 }
 0x6ed   :  { %v371_v7 = vmul.f32 %v369_v18, %v365_v17 }
 0x6ef   :  { %373 = vrot.lane.b32.xlu1 %v371_v7, %s1083_s7 }
 0x761   :  { %v374_v20 = vpop.permute.xlu1 %373 }
 0x762   :  { %v376_v22 = vadd.f32 %v374_v20, %v366_v19 }
 0x764   :  { %1015 = vtanh.f32 %v376_v22 }
 0x771   :  { %v1016_v23 = vpop.eup %1015 }
 0x772   :  { %379 = vrot.lane.b32.xlu0 %v1016_v23, %s1082_s3 }
 0x7e4   :  { %v380_v24 = vpop.permute.xlu0 %379 }
 0x7e5   :  { %v382_v25 = vmul.f32 %v380_v24, %v365_v17 }
 0x7e7   :  { %v383_v26 = vpack.c.bf16 %v382_v25, %v382_v25 }
 0x7e9   :  { %385 = vrot.lane.b32.xlu1 %v383_v26, %s1083_s7 }
 0x85b   :  { %v386_v27 = vpop.permute.xlu1 %385 }
 0x85c   :  { %935 = vmatmul.mubr.msk.bf16.vlgmr.msra.gmra.mxu1 %vm167_vm5, %v386_v27 }
 0x85d   :  { %947 = vmatpush3.bf16.msra.mxu1 %v1127_v2  ;;  %950 = vmatprep.mubr.msk.bf16.mxu1 %vm1080_vm1, %v1079_v1 }
 0x85e   :  { %948 = vmatprep.subr.bf16.mxu1 %v1079_v1 }
 0x861   :  { %949 = vmatpush3.bf16.msra.mxu1 %v1141_v5 }
 0x862   :  { %962 = vmatprep.subr.bf16.mxu1 %v1079_v1 }
 0x91c   :  { %v424_v29 = vpop.f32.mrf.mxu1 }
 0x91d   :  { %v430_v30 = vadd.f32 %v424_v29, %v131_v28 }
 0x91e   :  { %v936_v31 = vpop.f32.mrf.mxu1 }
 0x91f   :  { %v851_v32 = vmul.f32 -1.442695, %v430_v30 }
 0x920   :  { %v427_v33 = vpop.f32.mrf.mxu1 }
 0x921   :  { %1017 = vpow2.f32 %v851_v32 }
 0x922   :  { %v937_v34 = vpop.f32.mrf.mxu1  ;;  %1019 = vtanh.f32 %v430_v30 }
 0x92e   :  { %v1018_v36 = vpop.eup %1017 }
 0x92f   :  { %v435_v37 = vadd.f32 1.0, %v1018_v36  ;;  %v1020_v38 = vpop.eup %1019  ;;  %v144_v36 = vadd.f32 %v1210_v61, %v1164_v8 }
 0x931   :  { %1021 = vrcp.f32 %v435_v37 }
 0x93e   :  { %v1022_v39 = vpop.eup %1021 }
 0x93f   :  { %v438_v40 = vsel %vm1167_vm4, %v1020_v38, %v1022_v39 }
 0x940   :  { %441 = vrot.lane.b32.xlu0 %v438_v40, %s1082_s3  ;;  %v439_v42 = vmul.f32 %v438_v40, %v376_v22 }
 0x9b2   :  { %v442_v41 = vpop.permute.xlu0 %441 }
 0x9b3   :  { %v444_v35 = vmul.f32 %v442_v41, %v438_v40 }
 0x9b5   :  { %446 = vrot.lane.b32.xlu1 %v444_v35, %s1083_s7 }
 0xa27   :  { %v447_v43 = vpop.permute.xlu1 %446 }
 0xa28   :  { %v449_v44 = vadd.f32 %v447_v43, %v439_v42 }
 0xa2a   :  { %1023 = vtanh.f32 %v449_v44 }
 0xa37   :  { %v1024_v45 = vpop.eup %1023 }
 0xa38   :  { %452 = vrot.lane.b32.xlu0 %v1024_v45, %s1082_s3 }
 0xaaa   :  { %v453_v46 = vpop.permute.xlu0 %452 }
 0xaab   :  { %v455_v47 = vmul.f32 %v453_v46, %v438_v40 }
 0xaad   :  { %v456_v48 = vpack.c.bf16 %v455_v47, %v455_v47 }
 0xaaf   :  { %458 = vrot.lane.b32.xlu1 %v456_v48, %s1083_s7 }
 0xb21   :  { %v459_v49 = vpop.permute.xlu1 %458 }
 0xb22   :  { %943 = vmatmul.mubr.msk.bf16.vlgmr.msra.gmra.mxu0 %vm167_vm5, %v459_v49 }
 0xb23   :  { %955 = vmatpush3.bf16.msra.mxu0 %v1127_v2  ;;  %958 = vmatprep.mubr.msk.bf16.mxu0 %vm1080_vm1, %v1079_v1 }
 0xb24   :  { %956 = vmatprep.subr.bf16.mxu0 %v1079_v1 }
 0xb27   :  { %957 = vmatpush3.bf16.msra.mxu0 %v1141_v5 }
 0xb28   :  { %970 = vmatprep.subr.bf16.mxu0 %v1079_v1 }
 0xbe2   :  { %v497_v51 = vpop.f32.mrf.mxu0 }
 0xbe3   :  { %v503_v52 = vadd.f32 %v497_v51, %v136_v50 }
 0xbe4   :  { %v944_v53 = vpop.f32.mrf.mxu0 }
 0xbe5   :  { %v853_v54 = vmul.f32 -1.442695, %v503_v52 }
 0xbe6   :  { %v500_v55 = vpop.f32.mrf.mxu0 }
 0xbe7   :  { %1025 = vpow2.f32 %v853_v54 }
 0xbe8   :  { %v945_v56 = vpop.f32.mrf.mxu0  ;;  %1027 = vtanh.f32 %v503_v52 }
 0xbe9   :  { %v147_v56 = vadd.f32 %v1214_v63, %v1164_v8 }
 0xbf4   :  { %v1026_v57 = vpop.eup %1025 }
 0xbf5   :  { %v508_v58 = vadd.f32 1.0, %v1026_v57  ;;  %v1028_v59 = vpop.eup %1027 }
 0xbf7   :  { %1029 = vrcp.f32 %v508_v58 }
 0xc04   :  { %v1030_v60 = vpop.eup %1029 }
 0xc05   :  { %v511_v3 = vsel %vm1167_vm4, %v1028_v59, %v1030_v60 }
 0xc06   :  { %514 = vrot.lane.b32.xlu0 %v511_v3, %s1082_s3  ;;  %v512_v6 = vmul.f32 %v511_v3, %v449_v44 }
 0xc78   :  { %v515_v4 = vpop.permute.xlu0 %514 }
 0xc79   :  { %v517_v62 = vmul.f32 %v515_v4, %v511_v3 }
 0xc7b   :  { %519 = vrot.lane.b32.xlu1 %v517_v62, %s1083_s7 }
 0xced   :  { %v520_v9 = vpop.permute.xlu1 %519 }
 0xcee   :  { %v522_v10 = vadd.f32 %v520_v9, %v512_v6 }
 0xcf0   :  { %1031 = vtanh.f32 %v522_v10 }
 0xcfd   :  { %v1032_v11 = vpop.eup %1031 }
 0xcfe   :  { %525 = vrot.lane.b32.xlu0 %v1032_v11, %s1082_s3 }
 0xd70   :  { %v526_v12 = vpop.permute.xlu0 %525 }
 0xd71   :  { %v528_v13 = vmul.f32 %v526_v12, %v511_v3 }
 0xd73   :  { %v529_v14 = vpack.c.bf16 %v528_v13, %v528_v13 }
 0xd75   :  { %531 = vrot.lane.b32.xlu1 %v529_v14, %s1083_s7 }
 0xde7   :  { %v532_v15 = vpop.permute.xlu1 %531 }
 0xde8   :  { %951 = vmatmul.mubr.msk.bf16.vlgmr.msra.gmra.mxu1 %vm167_vm5, %v532_v15  ;;  %v991_v15 = vld [vmem:[%s1308_s4 + $0x8] sm:$0xff]   ;;  %s825_s4 = sshll.u32 %s1084_s17, 4  ;;  %s826_s4 = int_to_ptr.vmem [resolvable:$true] %s825_s4 }
 0xde9   :  { %963 = vmatpush3.bf16.msra.mxu1 %v1127_v2  ;;  %966 = vmatprep.mubr.msk.bf16.mxu1 %vm1080_vm1, %v1079_v1  ;;  %s1057_s18 = scalar_lea.vmem %s826_s4, 128  ;;  %p1062_p1 = scmp.lt.s32.totalorder %s826_s4, %s826_s4 }
 0xdea   :  { %964 = vmatprep.subr.bf16.mxu1 %v1079_v1  ;;  %p1058_p0 = scmp.ne.s32.totalorder %s826_s4, %s1057_s18  ;;  %p1063_p2 = scmp.lt.s32.totalorder %s1057_s18, %s1057_s18 }
 0xdec   :  { %p1064_p3 = por %p1063_p2, %p1062_p1 }
 0xded   :  { %965 = vmatpush3.bf16.msra.mxu1 %v1141_v5 }
 0xdee   :  { %p1065_p4 = pnand %p1064_p3, %p1058_p0 }
 0xea8   :  { %v570_v17 = vpop.f32.mrf.mxu1 }
 0xea9   :  { %v576_v18 = vadd.f32 %v570_v17, %v139_v16 }
 0xeaa   :  { %v952_v7 = vpop.f32.mrf.mxu1 }
 0xeab   :  { %v855_v19 = vmul.f32 -1.442695, %v576_v18 }
 0xeac   :  { %v573_v20 = vpop.f32.mrf.mxu1 }
 0xead   :  { %1033 = vpow2.f32 %v855_v19  ;;  %v860_v20 = vld [vmem:[%s1309_s5] ss:$0 sm:$0xff] }
 0xeae   :  { %v953_v22 = vpop.f32.mrf.mxu1  ;;  %1035 = vtanh.f32 %v576_v18 }
 0xeba   :  { %v1034_v23 = vpop.eup %1033 }
 0xebb   :  { %v581_v24 = vadd.f32 1.0, %v1034_v23  ;;  %v1036_v2 = vpop.eup %1035 }
 0xebd   :  { %1037 = vrcp.f32 %v581_v24 }
 0xeca   :  { %v1038_v25 = vpop.eup %1037 }
 0xecb   :  { %v584_v26 = vsel %vm1167_vm4, %v1036_v2, %v1038_v25 }
 0xecc   :  { %587 = vrot.lane.b32.xlu0 %v584_v26, %s1082_s3  ;;  %v585_v27 = vmul.f32 %v584_v26, %v522_v10 }
 0xf3e   :  { %v588_v5 = vpop.permute.xlu0 %587 }
 0xf3f   :  { %v590_v0 = vmul.f32 %v588_v5, %v584_v26 }
 0xf41   :  { %592 = vrot.lane.b32.xlu1 %v590_v0, %s1083_s7 }
 0xfb3   :  { %v593_v28 = vpop.permute.xlu1 %592 }
 0xfb4   :  { %v595_v29 = vadd.f32 %v593_v28, %v585_v27 }
 0xfb6   :  { %1039 = vtanh.f32 %v595_v29 }
 0xfc3   :  { %v1040_v30 = vpop.eup %1039 }
 0xfc4   :  { %598 = vrot.lane.b32.xlu0 %v1040_v30, %s1082_s3 }
0x1036   :  { %v599_v31 = vpop.permute.xlu0 %598 }
0x1037   :  { %v601_v32 = vmul.f32 %v599_v31, %v584_v26 }
0x1039   :  { %v602_v33 = vpack.c.bf16 %v601_v32, %v601_v32 }
0x103b   :  { %604 = vrot.lane.b32.xlu1 %v602_v33, %s1083_s7 }
0x10ad   :  { %v605_v34 = vpop.permute.xlu1 %604 }
0x10ae   :  { %959 = vmatmul.mubr.msk.bf16.vlgmr.msra.gmra.mxu0 %vm167_vm5, %v605_v34 }
0x10af   :  { %974 = vmatprep.mubr.msk.bf16.mxu0 %vm1080_vm1, %v1079_v1  ;;  %971 = vmatpush3.bf16.msra.mxu0 %v991_v15 }
0x10b0   :  { %972 = vmatprep.subr.bf16.mxu0 %v1079_v1 }
0x10b3   :  { %973 = vmatpush3.bf16.msra.mxu0 %v992_v21 }
0x116e   :  { %v643_v37 = vpop.f32.mrf.mxu0 }
0x116f   :  { %v649_v38 = vadd.f32 %v643_v37, %v144_v36 }
0x1170   :  { %v960_v39 = vpop.f32.mrf.mxu0 }
0x1171   :  { %v857_v40 = vmul.f32 -1.442695, %v649_v38 }
0x1172   :  { %v646_v41 = vpop.f32.mrf.mxu0 }
0x1173   :  { %1041 = vpow2.f32 %v857_v40 }
0x1174   :  { %v961_v35 = vpop.f32.mrf.mxu0  ;;  %1043 = vtanh.f32 %v649_v38 }
0x1180   :  { %v1042_v42 = vpop.eup %1041 }
0x1181   :  { %v654_v43 = vadd.f32 1.0, %v1042_v42  ;;  %v1044_v44 = vpop.eup %1043 }
0x1183   :  { %1045 = vrcp.f32 %v654_v43 }
0x1190   :  { %v1046_v45 = vpop.eup %1045 }
0x1191   :  { %v657_v46 = vsel %vm1167_vm4, %v1044_v44, %v1046_v45 }
0x1192   :  { %660 = vrot.lane.b32.xlu0 %v657_v46, %s1082_s3  ;;  %v658_v48 = vmul.f32 %v657_v46, %v595_v29 }
0x1204   :  { %v661_v47 = vpop.permute.xlu0 %660 }
0x1205   :  { %v663_v61 = vmul.f32 %v661_v47, %v657_v46 }
0x1207   :  { %665 = vrot.lane.b32.xlu1 %v663_v61, %s1083_s7 }
0x1279   :  { %v666_v49 = vpop.permute.xlu1 %665 }
0x127a   :  { %v668_v50 = vadd.f32 %v666_v49, %v658_v48 }
0x127c   :  { %1047 = vtanh.f32 %v668_v50 }
0x1289   :  { %v1048_v51 = vpop.eup %1047 }
0x128a   :  { %671 = vrot.lane.b32.xlu0 %v1048_v51, %s1082_s3 }
0x12fc   :  { %v672_v52 = vpop.permute.xlu0 %671 }
0x12fd   :  { %v674_v53 = vmul.f32 %v672_v52, %v657_v46 }
0x12ff   :  { %v675_v54 = vpack.c.bf16 %v674_v53, %v674_v53 }
0x1301   :  { %677 = vrot.lane.b32.xlu1 %v675_v54, %s1083_s7 }
0x1373   :  { %v678_v55 = vpop.permute.xlu1 %677 }
0x1374   :  { %967 = vmatmul.mubr.msk.bf16.vlgmr.msra.gmra.mxu1 %vm167_vm5, %v678_v55 }
0x1434   :  { %v716_v57 = vpop.f32.mrf.mxu1 }
0x1435   :  { %v722_v58 = vadd.f32 %v716_v57, %v147_v56 }
0x1436   :  { %v968_v59 = vpop.f32.mrf.mxu1 }
0x1437   :  { %v859_v60 = vmul.f32 -1.442695, %v722_v58 }
0x1438   :  { %v719_v3 = vpop.f32.mrf.mxu1 }
0x1439   :  { %1049 = vpow2.f32 %v859_v60 }
0x143a   :  { %v969_v4 = vpop.f32.mrf.mxu1  ;;  %1051 = vtanh.f32 %v722_v58 }
0x1446   :  { %v1050_v62 = vpop.eup %1049 }
0x1447   :  { %v727_v6 = vadd.f32 1.0, %v1050_v62  ;;  %v1052_v9 = vpop.eup %1051 }
0x1449   :  { %1053 = vrcp.f32 %v727_v6 }
0x1456   :  { %v1054_v10 = vpop.eup %1053 }
0x1457   :  { %v730_v11 = vsel %vm1167_vm4, %v1052_v9, %v1054_v10 }
0x1458   :  { %733 = vrot.lane.b32.xlu0 %v730_v11, %s1082_s3  ;;  %v731_v63 = vmul.f32 %v730_v11, %v668_v50 }
0x14ca   :  { %v734_v12 = vpop.permute.xlu0 %733 }
0x14cb   :  { %v736_v8 = vmul.f32 %v734_v12, %v730_v11 }
0x14cd   :  { %738 = vrot.lane.b32.xlu1 %v736_v8, %s1083_s7 }
0x153f   :  { %v739_v13 = vpop.permute.xlu1 %738 }
0x1540   :  { %v741_v14 = vadd.f32 %v739_v13, %v731_v63 }
0x1542   :  { %1055 = vtanh.f32 %v741_v14 }
0x154f   :  { %v1056_v16 = vpop.eup %1055 }
0x1550   :  { %744 = vrot.lane.b32.xlu0 %v1056_v16, %s1082_s3 }
0x15c2   :  { %v745_v17 = vpop.permute.xlu0 %744 }
0x15c3   :  { %v747_v18 = vmul.f32 %v745_v17, %v730_v11 }
0x15c5   :  { %v748_v7 = vpack.c.bf16 %v747_v18, %v747_v18 }
0x15c7   :  { %761 = vrot.lane.b32.xlu1 %v748_v7, %s1083_s7 }
0x1639   :  { %v762_v19 = vpop.permute.xlu1 %761 }
0x163a   :  { %975 = vmatmul.mubr.msk.bf16.vlgmr.msra.gmra.mxu0 %vm167_vm5, %v762_v19 }
0x16fa   :  { %v812_v22 = vpop.f32.mrf.mxu0 }
0x16fb   :  { %v813_v1 = vadd.f32 %v860_v20, %v812_v22 }
0x16fc   :  { %v976_v23 = vpop.f32.mrf.mxu0 }
0x16fd   :  { %818 = vst [vmem:[#allocation2] sm:$0xff] %v813_v1 }
0x16fe   :  { %v815_v24 = vpop.f32.mrf.mxu0 }
0x16ff   :  { %1068 = shalt.err (!%p1065_p4)
}
0x1700   :  { %828 = dma.vmem_to_hbm [thread:$0]  %s826_s4, 128, %s1310_s6, [#allocation3]   ;;  %v977_v2 = vpop.f32.mrf.mxu0 }
0x1701   :  { %1077 = dma.done.wait [#allocation3], 128  }
0x1702   :  { %1078 = vsyncadd [#allocation3], 4294967168 }
0x1703   :  { %832 = vsyncpa [#allocation3], 1 }

</bundles_post_ra>
